<compile_context>
chip_gen: v5e
topology: v5e:2x2
jax: 0.10.0
libtpu: 0.0.40
codegen_flags: <defaults>
</compile_context>

<pallas_src>
import functools

import jax
import jax.numpy as jnp
from jax.experimental import pallas as pl
from jax.experimental.pallas import tpu as pltpu

LN_EPS = 1e-5  # PyTorch nn.LayerNorm default


def _round_up(x, m):
    return (x + m - 1) // m * m


def _vmem_budget_bytes():
    """~75% of physical VMEM (v5e/v6e: 128 MiB -> 96 MiB, v7x: 64 MiB -> 48 MiB)."""
    try:
        cap = int(pltpu.get_tpu_info().vmem_capacity_bytes)
        return max((cap * 3) // 4, 16 << 20)
    except Exception:  # not queryable -> conservative default that fits v7x
        return 48 << 20


def _const_spec(block_shape, index_map):
    """BlockSpec for a grid-resident operand; single-buffer it to save VMEM."""
    try:
        return pl.BlockSpec(block_shape, index_map, pipeline_mode=pl.Buffered(1))
    except TypeError:  # older jax without pipeline_mode: accept default buffering
        return pl.BlockSpec(block_shape, index_map)


# ----------------------------------------------------------------------------
# Kernels
# ----------------------------------------------------------------------------
def _layernorm_rows(y, gamma, beta, e_true):
    """Row-wise LayerNorm over the first e_true lanes of y (padded lanes are 0)."""
    inv_e = jnp.float32(1.0 / e_true)
    mean = jnp.sum(y, axis=-1, keepdims=True) * inv_e      # padded lanes are zero
    d = y - mean
    if y.shape[-1] != e_true:                               # mask padded lanes
        lane = jax.lax.broadcasted_iota(jnp.int32, y.shape, y.ndim - 1)
        d = jnp.where(lane < e_true, d, 0.0)
    var = jnp.sum(d * d, axis=-1, keepdims=True) * inv_e    # centered two-pass
    scale = jax.lax.rsqrt(var + LN_EPS) * gamma              # rsqrt -> EUP slot
    return d * scale + beta


def _linear_ln_kernel(x_ref, w_ref, p_ref, o_ref, *, e_true):
    """Fused Linear + LayerNorm, whole C reduction in one matmul."""
    y = jnp.dot(x_ref[...], w_ref[...], preferred_element_type=jnp.float32)
    y = y + p_ref[0:1, :]                                    # bias
    o_ref[...] = _layernorm_rows(y, p_ref[1:2, :], p_ref[2:3, :],
                                 e_true).astype(o_ref.dtype)


def _linear_ln_ksplit_kernel(x_ref, w_ref, p_ref, o_ref, *, e_true):
    """Same op with the C reduction split over a trailing 'arbitrary' grid axis.
    The f32 output block is resident across k and used as the accumulator."""
    k = pl.program_id(1)

    @pl.when(k == 0)
    def _():
        o_ref[...] = jnp.zeros_like(o_ref)

    o_ref[...] += jnp.dot(x_ref[...], w_ref[...],
                          preferred_element_type=jnp.float32)

    @pl.when(k == pl.num_programs(1) - 1)
    def _():
        y = o_ref[...] + p_ref[0:1, :]                        # bias
        o_ref[...] = _layernorm_rows(y, p_ref[1:2, :], p_ref[2:3, :],
                                     e_true).astype(o_ref.dtype)


# ----------------------------------------------------------------------------
# Wrappers
# ----------------------------------------------------------------------------
def prepare_params(weight, bias, gamma, beta, matmul_dtype=None):
    """One-time parameter prep: pad E to a lane-dense multiple of 128, pack
    bias/gamma/beta into one resident (3, E_pad) block, optionally cast the
    weight for full-rate bf16 MXU matmuls.  Call once, reuse across forwards."""
    c, e = weight.shape
    e_pad = _round_up(e, 128)
    if matmul_dtype is None:
        # f32 matmul is a multi-pass MXU emulation on v5e/v6e/v7x; use bf16
        # inputs only when the problem is clearly matmul-bound.
        matmul_dtype = jnp.bfloat16 if (c >= 1024 and e >= 512) else jnp.float32
    pad_e = e_pad - e
    if pad_e:
        # Zero columns keep padded output lanes exactly zero through the
        # matmul; they are masked inside the LN and sliced off by the wrapper.
        weight = jnp.pad(weight, ((0, 0), (0, pad_e)))
        bias = jnp.pad(bias, ((0, pad_e),))
        gamma = jnp.pad(gamma, ((0, pad_e),))
        beta = jnp.pad(beta, ((0, pad_e),))
    affine = jnp.stack([bias.astype(jnp.float32),
                        gamma.astype(jnp.float32),
                        beta.astype(jnp.float32)], axis=0)    # (3, E_pad), f32
    return {"weight": weight.astype(matmul_dtype), "affine": affine, "e": e}


def chint_embed_apply(x, params, *, k_tile=None, interpret=False):
    """x: (..., C). params from prepare_params. Returns (..., E) float32."""
    weight = params["weight"]
    affine = params["affine"]
    e_true = params["e"]
    c, e_pad = weight.shape

    orig_shape = x.shape
    assert orig_shape[-1] == c, (orig_shape, c)
    x2d = x.reshape(-1, c).astype(weight.dtype)   # bf16 cast (if any) halves x DMA
    m = x2d.shape[0]

    budget = _vmem_budget_bytes()
    x_item = x2d.dtype.itemsize
    w_item = weight.dtype.itemsize
    p_bytes = 8 * e_pad * 4                        # (3, E_pad) sublane-pads to 8 rows

    # ---- reduction (C) split decision ---------------------------------------
    if k_tile is None:
        # Keep the single-buffered resident weight to <= ~half the budget so
        # x/out tiles stay large; otherwise split the C axis.
        k_tile = 0 if c * e_pad * w_item <= budget // 2 else 512
    tk = 0
    if k_tile:
        for cand in range(min(c, k_tile) // 128 * 128, 0, -128):
            if c % cand == 0:
                tk = cand
                break
        if tk == 0:
            # C not a multiple of 128: zero-pad the reduction dim (exact — the
            # padded x columns / weight rows contribute zero to the sum).
            tk = 128
            c_pad = _round_up(c, tk)
            x2d = jnp.pad(x2d, ((0, 0), (0, c_pad - c)))
            weight = jnp.pad(weight, ((0, c_pad - c), (0, 0)))
            c = c_pad

    # ---- row-tile size from the VMEM budget ----------------------------------
    out_row_bytes = e_pad * 4                      # output is f32
    if k_tile:
        resident = 2 * tk * e_pad * w_item + p_bytes      # weight double-buffered
        per_row = 2 * tk * x_item + 2 * out_row_bytes
    else:
        resident = c * e_pad * w_item + p_bytes            # weight single-buffered
        per_row = 2 * c * x_item + 2 * out_row_bytes

    avail = max(budget - resident, 0)
    tm = (avail // max(per_row, 1)) // 8 * 8
    tm = max(8, min(2048, int(tm)))
    if m <= 8:
        tm = m                                      # full-extent single row block
    else:
        # >= 2 row tiles so dimension_semantics=("parallel", ...) can split the
        # rows across v7x's two TensorCores.
        tm = max(8, min(tm, _round_up(pl.cdiv(m, 2), 8)))
    grid_m = pl.cdiv(m, tm)

    # ---- specs ---------------------------------------------------------------
    if k_tile:
        grid = (grid_m, c // tk)
        in_specs = [
            pl.BlockSpec((tm, tk), lambda i, k: (i, k)),       # x tile
            pl.BlockSpec((tk, e_pad), lambda i, k: (k, 0)),    # weight slab
            _const_spec((3, e_pad), lambda i, k: (0, 0)),      # bias/gamma/beta
        ]
        out_specs = pl.BlockSpec((tm, e_pad), lambda i, k: (i, 0))
        dim_sem = ("parallel", "arbitrary")
        kernel = functools.partial(_linear_ln_ksplit_kernel, e_true=e_true)
    else:
        grid = (grid_m,)
        in_specs = [
            pl.BlockSpec((tm, c), lambda i: (i, 0)),           # x: moves with grid
            _const_spec((c, e_pad), lambda i: (0, 0)),         # weight: resident
            _const_spec((3, e_pad), lambda i: (0, 0)),         # bias/gamma/beta
        ]
        out_specs = pl.BlockSpec((tm, e_pad), lambda i: (i, 0))
        dim_sem = ("parallel",)
        kernel = functools.partial(_linear_ln_kernel, e_true=e_true)

    cost = pl.CostEstimate(
        flops=2 * m * c * e_pad,
        transcendentals=m,
        bytes_accessed=(m * c * x_item + c * e_pad * w_item
                        + 3 * e_pad * 4 + m * e_pad * 4),
    )

    out = pl.pallas_call(
        kernel,
        out_shape=jax.ShapeDtypeStruct((m, e_pad), jnp.float32),
        grid_spec=pltpu.PrefetchScalarGridSpec(
            num_scalar_prefetch=0,
            grid=grid,
            in_specs=in_specs,
            out_specs=out_specs,
        ),
        compiler_params=pltpu.CompilerParams(
            dimension_semantics=dim_sem,
            vmem_limit_bytes=int(budget),
        ),
        cost_estimate=cost,
        interpret=interpret,
    )(x2d, weight, affine)

    if e_pad != e_true:
        out = out[:, :e_true]
    return out.reshape(*orig_shape[:-1], e_true)


def chint_embed_forward(x, weight, bias, gamma, beta, **kwargs):
    """One-shot convenience wrapper.  For repeated calls, prepare_params once."""
    return chint_embed_apply(x, prepare_params(weight, bias, gamma, beta), **kwargs)


# ----------------------------------------------------------------------------
# Test harness
# ----------------------------------------------------------------------------
def _init_params(key, c, embed_dim):
    """Deterministic synthetic parameters matching the module's shapes."""
    k_w, k_b, k_g, k_beta = jax.random.split(key, 4)
    limit = 1.0 / jnp.sqrt(jnp.float32(c))
    weight = jax.random.uniform(k_w, (c, embed_dim), jnp.float32, -limit, limit)
    bias = jax.random.uniform(k_b, (embed_dim,), jnp.float32, -limit, limit)
    gamma = 1.0 + 0.1 * jax.random.normal(k_g, (embed_dim,), jnp.float32)
    beta = 0.1 * jax.random.normal(k_beta, (embed_dim,), jnp.float32)
    return weight, bias, gamma, beta


def _reference(x, weight, bias, gamma, beta):
    y = jnp.einsum("...c,ce->...e", x, weight,
                   precision=jax.lax.Precision.HIGHEST) + bias
    mean = jnp.mean(y, axis=-1, keepdims=True)
    var = jnp.mean((y - mean) ** 2, axis=-1, keepdims=True)
    y_hat = (y - mean) / jnp.sqrt(var + LN_EPS)
    return y_hat * gamma + beta


if __name__ == "__main__":
    key = jax.random.PRNGKey(0)
    k_x, k_p, k_x2, k_p2 = jax.random.split(key, 4)

    # --- case 1: small shapes, fused resident-weight path ---------------------
    B, S, C, E = 2, 8, 4, 32  # batch, seq, channels, embed_dim
    x = jax.random.normal(k_x, (B, S, C), jnp.float32)
    weight, bias, gamma, beta = _init_params(k_p, C, E)
    params = prepare_params(weight, bias, gamma, beta)
    out = jax.block_until_ready(chint_embed_apply(x, params))
    ref = _reference(x, weight, bias, gamma, beta)
    assert out.shape == (B, S, E), out.shape
    assert jnp.allclose(out, ref, atol=1e-5, rtol=1e-5), "fused path mismatch"

    # --- case 2: forced K-split + partial row tile + padded E lanes ------------
    M2, C2, E2 = 40, 384, 160
    x2 = jax.random.normal(k_x2, (M2, C2), jnp.float32)
    w2, b2, g2, bt2 = _init_params(k_p2, C2, E2)
    params2 = prepare_params(w2, b2, g2, bt2, matmul_dtype=jnp.float32)
    out2 = jax.block_until_ready(chint_embed_apply(x2, params2, k_tile=128))
    ref2 = _reference(x2, w2, b2, g2, bt2)
    assert out2.shape == (M2, E2), out2.shape
    assert jnp.allclose(out2, ref2, atol=1e-4, rtol=1e-4), "k-split path mismatch"

    print("KERNEL_OK")
</pallas_src>

<mosaic_0001>
module attributes {stable_mosaic.version = 11 : i64} {
  func.func @_linear_ln_kernel(%arg0: i32, %arg1: memref<8x4xf32, #tpu.memory_space<vmem>>, %arg2: memref<4x128xf32, #tpu.memory_space<vmem>>, %arg3: memref<3x128xf32, #tpu.memory_space<vmem>>, %arg4: memref<8x128xf32, #tpu.memory_space<vmem>>) attributes {dimension_semantics = [#tpu.dimension_semantics<parallel>], iteration_bounds = array<i64: 2>, scalar_prefetch = 0 : i64, scratch_operands = 0 : i64, tpu.core_type = #tpu.core_type<tc>, window_params = [{transform_indices = @transform_0, window_bounds = array<i64: 8, 4>}, {pipeline_mode = #tpu.pipeline_mode<synchronous>, transform_indices = @transform_1, window_bounds = array<i64: 4, 128>}, {pipeline_mode = #tpu.pipeline_mode<synchronous>, transform_indices = @transform_2, window_bounds = array<i64: 3, 128>}, {transform_indices = @transform_3, window_bounds = array<i64: 8, 128>}]} {
    %c0 = arith.constant 0 : index
    %c0_0 = arith.constant 0 : index
    %0 = vector.load %arg1[%c0, %c0_0] : memref<8x4xf32, #tpu.memory_space<vmem>>, vector<8x4xf32>
    %c0_1 = arith.constant 0 : index
    %c0_2 = arith.constant 0 : index
    %1 = vector.load %arg2[%c0_1, %c0_2] : memref<4x128xf32, #tpu.memory_space<vmem>>, vector<4x128xf32>
    %cst = arith.constant dense<0.000000e+00> : vector<8x128xf32>
    %2 = tpu.matmul %0, %1, %cst {dimension_numbers = #tpu.dot_dimension_numbers<[1], [0], [0], [1], [0, 0, 1, 1], [], []>} : vector<8x4xf32>, vector<4x128xf32>, vector<8x128xf32> -> vector<8x128xf32>
    %c0_3 = arith.constant 0 : index
    %c0_4 = arith.constant 0 : index
    %3 = vector.load %arg3[%c0_3, %c0_4] : memref<3x128xf32, #tpu.memory_space<vmem>>, vector<1x128xf32>
    %4 = vector.broadcast %3 : vector<1x128xf32> to vector<8x128xf32>
    %5 = arith.addf %2, %4 : vector<8x128xf32>
    %c1 = arith.constant 1 : index
    %c0_5 = arith.constant 0 : index
    %6 = vector.load %arg3[%c1, %c0_5] : memref<3x128xf32, #tpu.memory_space<vmem>>, vector<1x128xf32>
    %c2 = arith.constant 2 : index
    %c0_6 = arith.constant 0 : index
    %7 = vector.load %arg3[%c2, %c0_6] : memref<3x128xf32, #tpu.memory_space<vmem>>, vector<1x128xf32>
    %cst_7 = arith.constant dense<0.000000e+00> : vector<8xf32>
    %8 = vector.multi_reduction <add>, %5, %cst_7 [1] : vector<8x128xf32> to vector<8xf32>
    %9 = vector.shape_cast %8 : vector<8xf32> to vector<8x1xf32>
    %cst_8 = arith.constant 3.125000e-02 : f32
    %10 = vector.broadcast %cst_8 : f32 to vector<8x1xf32>
    %11 = arith.mulf %9, %10 : vector<8x1xf32>
    %12 = vector.broadcast %11 : vector<8x1xf32> to vector<8x128xf32>
    %13 = arith.subf %5, %12 : vector<8x128xf32>
    %14 = tpu.iota {dimensions = array<i32: 1>} : vector<8x128xi32>
    %c32_i32 = arith.constant 32 : i32
    %15 = vector.broadcast %c32_i32 : i32 to vector<8x128xi32>
    %16 = arith.cmpi slt, %14, %15 : vector<8x128xi32>
    %cst_9 = arith.constant 0.000000e+00 : f32
    %17 = vector.broadcast %cst_9 : f32 to vector<8x128xf32>
    %18 = arith.select %16, %13, %17 : vector<8x128xi1>, vector<8x128xf32>
    %19 = arith.mulf %18, %18 : vector<8x128xf32>
    %cst_10 = arith.constant dense<0.000000e+00> : vector<8xf32>
    %20 = vector.multi_reduction <add>, %19, %cst_10 [1] : vector<8x128xf32> to vector<8xf32>
    %21 = vector.shape_cast %20 : vector<8xf32> to vector<8x1xf32>
    %cst_11 = arith.constant 3.125000e-02 : f32
    %22 = vector.broadcast %cst_11 : f32 to vector<8x1xf32>
    %23 = arith.mulf %21, %22 : vector<8x1xf32>
    %cst_12 = arith.constant 9.99999974E-6 : f32
    %24 = vector.broadcast %cst_12 : f32 to vector<8x1xf32>
    %25 = arith.addf %23, %24 : vector<8x1xf32>
    %26 = math.rsqrt %25 : vector<8x1xf32>
    %27 = vector.broadcast %26 : vector<8x1xf32> to vector<8x128xf32>
    %28 = vector.broadcast %6 : vector<1x128xf32> to vector<8x128xf32>
    %29 = arith.mulf %27, %28 : vector<8x128xf32>
    %30 = arith.mulf %18, %29 : vector<8x128xf32>
    %31 = vector.broadcast %7 : vector<1x128xf32> to vector<8x128xf32>
    %32 = arith.addf %30, %31 : vector<8x128xf32>
    %c0_13 = arith.constant 0 : index
    %c0_14 = arith.constant 0 : index
    %33 = vector.load %arg4[%c0_13, %c0_14] : memref<8x128xf32, #tpu.memory_space<vmem>>, vector<8x128xf32>
    tpu.vector_store %arg4[%c0_13, %c0_14], %32 {strides = array<i32>} : memref<8x128xf32, #tpu.memory_space<vmem>>, vector<8x128xf32>,
    return
  }
  func.func @transform_0(%arg0: i32) -> (i32, i32) {
    %c0_i32 = arith.constant 0 : i32
    %c0_i32_0 = arith.constant 0 : i32
    return %arg0, %c0_i32 : i32, i32
  }
  func.func @transform_1(%arg0: i32) -> (i32, i32) {
    %c0_i32 = arith.constant 0 : i32
    %c0_i32_0 = arith.constant 0 : i32
    %c0_i32_1 = arith.constant 0 : i32
    return %c0_i32, %c0_i32_0 : i32, i32
  }
  func.func @transform_2(%arg0: i32) -> (i32, i32) {
    %c0_i32 = arith.constant 0 : i32
    %c0_i32_0 = arith.constant 0 : i32
    %c0_i32_1 = arith.constant 0 : i32
    return %c0_i32, %c0_i32_0 : i32, i32
  }
  func.func @transform_3(%arg0: i32) -> (i32, i32) {
    %c0_i32 = arith.constant 0 : i32
    %c0_i32_0 = arith.constant 0 : i32
    return %arg0, %c0_i32 : i32, i32
  }
}

</mosaic_0001>

<bundles_post_ra>
// kernel: tpu_custom_call.1
= control target key start
LH: loop header
LB: loop body
LE: loop exit
PB: predicated region body
PF: predicated region fallthrough
CT: control target
= control target key end

     0   :  { %8 = vsyncpa [#allocation3], 0  ;;  %s541_s0 = inlined_call_operand.vmem [shape: f32[16,4], index: 0, kind: input, shape index: {}]   ;;  %s542_s1 = inlined_call_operand.vmem [shape: f32[4,128], index: 1, kind: input, shape index: {}]   ;;  %s543_s2 = inlined_call_operand.vmem [shape: f32[3,128], index: 2, kind: input, shape index: {}]   ;;  %s544_s3 = inlined_call_operand.hbm [shape: f32[16,128], index: 3, kind: output, shape index: {}]  }
   0x1   :  { %10 = vsyncpa [#allocation3 + $0x1], 0  ;;  %s444_s12 = smov 0   ;;  %s446_s13 = smov 0  }
   0x2   :  { %s448_s14 = smov 0   ;;  %s450_s15 = smov 0  }
   0x3 LB: > { %s465_s16 = sadd.s32 4294967295, %s422_s15   ;;  %s304_s17 = sadd.s32 4294967294, %s422_s15   ;;  %s422_s15 = sphi %s450_s15, %s550_s15   ;;  %s418_s14 = sphi %s448_s14, %s549_s14   ;;  %s414_s13 = sphi %s446_s13, %s548_s13   ;;  %s410_s12 = sphi %s444_s12, %s547_s12  }
   0x4   : > { %s469_s18 = sadd.s32 1, %s422_s15   ;;  %s91_s19 = sadd.s32 1, %s418_s14 }
   0x5   : > { %s88_s20 = ssub.s32 %s422_s15, %s469_s18  ;;  %p101_p0 = scmp.ne.s32.totalorder %s418_s14, %s414_s13 }
   0x6   : > { %p89_p1 = scmp.eq.s32.totalorder %s88_s20, 0  ;;  %p102_p2 = scmp.eq.s32.totalorder %s465_s16, 1 }
   0x7   : > { %p107_p3 = scmp.ne.s32.totalorder %s414_s13, %s410_s12  ;;  %p108_p4 = scmp.eq.s32.totalorder %s304_s17, 1 }
   0x8   : > { %s480_s21 = scalar_select %p89_p1, %s418_s14, %s91_s19  }
   0x9   : > { %p482_p5 = por %p102_p2, %p101_p0  ;;  %p486_p6 = por %p108_p4, %p107_p3 }
   0xa   : > { %p307_p7 = scmp.ge.s32.totalorder %s422_s15, 1  ;;  %p139_p8 = scmp.lt.s32.totalorder %s422_s15, 3 }
   0xc   : > { %p140_p9 = pnand %p307_p7, %p139_p8 }
   0xd   : > { %p162_p10 = scmp.lt.s32.totalorder (!%p140_p9), %s465_s16, 1  ;;  %s159_s6 = sand.u32 (!%p140_p9), 1, %s414_s13  }
   0xe   : > { %143 = sbr.rel (%p140_p9) target bundleno = 422 (0x1a6), region = 32  ;;  %s308_s7 = sshll.u32 (!%p140_p9), %s159_s6, 3 }
   0xf   : > { %s313_s8 = sshll.u32 (!%p140_p9), %s465_s16, 3  ;;  %s161_s25 = scalar_lea.vmem (!%p140_p9), [#allocation2], %s308_s7 }
  0x10   : > { %s240_s19 = scalar_lea.hbm (!%p140_p9), %s544_s3, %s313_s8  ;;  %s380_s5 = scalar_lea.hbm (!%p140_p9), %s544_s3, 16 }
  0x13   : > { %v167_v0 = vld [vmem:[%s542_s1] sm:$0xf]  ;;  %vm174_vm0 = vcmask 1043456   ;;  %s163_s26 = scalar_select %p162_p10, %s465_s16, 1  ;;  %vm170_vm1 = vcmask 31744   ;;  %v204_v5 = vlaneseq }
  0x14   : > { %310 = vmatpush.msk.msra.mxu0 %vm174_vm0, %v167_v0  ;;  %v355_v2 = vld [vmem:[%s543_s2] ss:$0 sm:$0xff]  ;;  %v356_v20 = vld [vmem:[%s543_s2 + $0x1] ss:$0 sm:$0xff]  ;;  %v357_v24 = vld [vmem:[%s543_s2 + $0x2] ss:$0 sm:$0xff] }
  0x15   : > { %s309_s27 = sshll.u32 %s163_s26, 3  ;;  %v205_v6 = vand.u32 127, %v204_v5  ;;  %s242_s16 = sshll.u32 %s161_s25, 4  ;;  %s243_s16 = int_to_ptr.vmem [resolvable:$true] %s242_s16 }
  0x16   : > { %s165_s30 = scalar_lea.vmem %s541_s0, %s309_s27  ;;  %s244_s26 = sshll.u32 %s240_s19, 4  ;;  %s245_s26 = int_to_ptr.hbm [resolvable:$true] %s244_s26 }
  0x17   : > { %v166_v1 = vld [vmem:[%s165_s30] sm:$0xff]  ;;  %vm206_vm2 = vcmp.lt.s32.totalorder %v205_v6, 32  ;;  %s230_s27 = scalar_lea.sflag [#allocation3], %s159_s6  ;;  %s374_s28 = sshra.s32 %s245_s26, 4  ;;  %s375_s28 = int_to_ptr.hbm [resolvable:$true] %s374_s28 }
  0x18   : > { %311 = vmatmul.msk.f32.vlgmr.msra.gmra.mxu0 %vm170_vm1, %v166_v1  ;;  %s376_s29 = scalar_lea.hbm %s375_s28, 8  ;;  %p381_p0 = scmp.lt.s32.totalorder %s375_s28, %s544_s3 }
  0x19   : > { %p377_p11 = scmp.ne.s32.totalorder %s375_s28, %s376_s29  ;;  %p382_p1 = scmp.lt.s32.totalorder %s380_s5, %s376_s29 }
  0x1b   : > { %p378_p12 = pnand %p377_p11, %p482_p5  ;;  %p383_p2 = por %p382_p1, %p381_p0 }
  0x1d   : > { %p379_p13 = pneg %p378_p12 }
  0x1f   : > { %p384_p3 = pnand %p383_p2, %p379_p13 }
  0x95   : > { %v195_v3 = vpop.f32.mrf.mxu0 }
  0x96   : > { %v196_v4 = vadd.f32 %v355_v2, %v195_v3 }
  0x98   : > { %200 = vadd.xlane.f32.xlu0 %v196_v4 }
 0x10b   : > { %v201_v7 = vpop.xlane.xlu0 %200 }
 0x10c   : > { %v202_v8 = vmul.f32 0.03125, %v201_v7 }
 0x10e   : > { %v203_v9 = vsub.f32 %v196_v4, %v202_v8 }
 0x110   : > { %v207_v10 = vsel %vm206_vm2, %v203_v9, 0.0 }
 0x111   : > { %v208_v11 = vmul.f32 %v207_v10, %v207_v10 }
 0x113   : > { %209 = vadd.xlane.f32.xlu0 %v208_v11 }
 0x186   : > { %v210_v12 = vpop.xlane.xlu0 %209 }
 0x187   : > { %v211_v13 = vmul.f32 0.03125, %v210_v12 }
 0x189   : > { %v212_v14 = vadd.f32 1e-05, %v211_v13 }
 0x18b   : > { %358 = vrsqrt.f32 %v212_v14  ;;  %vm219_vm4 = vweird.f32 %v212_v14 }
 0x191   : > { %v359_v15 = vpop.eup %358 }
 0x192   : > { %v214_v16 = vmul.f32 %v359_v15, %v212_v14  ;;  %vm220_vm3 = vweird.f32 %v359_v15 }
 0x193   : > { %vm221_vm5 = vmor %vm219_vm4, %vm220_vm3 }
 0x194   : > { %v215_v17 = vmul.f32 %v359_v15, %v214_v16 }
 0x196   : > { %v216_v18 = vmul.f32 0.5, %v215_v17 }
 0x198   : > { %v217_v19 = vsub.f32 1.5, %v216_v18 }
 0x19a   : > { %v218_v21 = vmul.f32 %v359_v15, %v217_v19 }
 0x19c   : > { %v222_v22 = vsel %vm221_vm5, %v359_v15, %v218_v21 }
 0x19d   : > { %v224_v23 = vmul.f32 %v356_v20, %v222_v22 }
 0x19f   : > { %v225_v25 = vmul.f32 %v224_v23, %v207_v10 }
 0x1a1   : > { %v227_v26 = vadd.f32 %v357_v24, %v225_v25 }
 0x1a3   : > { %228 = vst [vmem:[%s161_s25] sm:$0xff] %v227_v26 }
 0x1a4   : > { %387 = shalt.err (!%p384_p3)
}
 0x1a5   : > { %316 = dma.vmem_to_hbm [thread:$0]  (%p482_p5), %s243_s16, 128, %s245_s26, %s230_s27  }
 0x1a6 PF: > { %p322_p4 = scmp.ge.s32.totalorder %s422_s15, 2  ;;  %s256_s6 = sand.u32 1, %s410_s12  }
 0x1a7   : > { %s257_s9 = scalar_lea.sflag [#allocation3], %s256_s6 }
 0x1a8   : > { %p319_p7 = pnand %p322_p4, %p486_p6 }
 0x1aa   : > { %p320_p8 = pneg %p319_p7 }
 0x1ac   : > { %405 = dma.done.wait (%p320_p8), %s257_s9, 128  }
 0x1ad   : > { %407 = vsyncadd (%p320_p8), %s257_s9, 4294967168  ;;  %p13_p9 = scmp.ge.s32.totalorder %s469_s18, 4   ;;  %s547_s12 = smov %s414_s13 }
 0x1ae   : > { %s548_s13 = smov %s418_s14  ;;  %s549_s14 = smov %s480_s21 }
 0x1af   : > { %s550_s15 = smov %s469_s18  ;;  %15 = sbr.rel (!%p13_p9) target bundleno = 3 (0x3), region = 67 }
 0x1b4   :  { %263 = vsyncpa [#allocation3], 1 }
 0x1b5   :  { %265 = vsyncpa [#allocation3 + $0x1], 1 }

</bundles_post_ra>
